<compile_context>
chip_gen: v5e
topology: v5e:2x2
jax: 0.10.0
libtpu: 0.0.40
codegen_flags: <defaults>
</compile_context>

<pallas_src>
import functools

import jax
import jax.numpy as jnp
from jax import lax
from jax.experimental import pallas as pl
from jax.experimental.pallas import tpu as pltpu

LANE = 128


def _round_up(n, m):
    return (n + m - 1) // m * m


# --------------------------- fused forward kernel ---------------------------
def _fused_kernel(x_ref, wd_ref, wc_ref, vecs_ref, *out_refs, w, n_layers):
    """out0 = x @ W_down + b_down ; out_{i+1} = ELU(BN(conv_w(out_i))).

    All operands and every pyramid level live in VMEM for the whole invocation.
    vecs_ref rows: [0] down-bias, then per layer i: [1+3i] conv bias,
    [2+3i] BN gamma, [3+3i] BN beta.  wc_ref[i*w + k] is the (C_pad, C_pad)
    matmul matrix for conv tap k of layer i (already transposed / padded / bf16).
    """
    c_pad = out_refs[0].shape[1]

    # ---- `down` Linear (lane-dense (N0, c_pad) result, bf16 MXU, f32 accum) ----
    y0 = jnp.dot(x_ref[...], wd_ref[...], preferred_element_type=jnp.float32)
    out_refs[0][...] = y0 + vecs_ref[pl.ds(0, 1), :]

    # ---- conv -> BatchNorm(train) -> ELU pyramid ----
    for i in range(n_layers):
        src = out_refs[i]          # previous level, already in VMEM
        dst = out_refs[i + 1]
        n_out = dst.shape[0]

        # Strided conv1d (stride == kernel_size == w) as w per-tap matmuls:
        #   y[r, co] = bias[co] + sum_k sum_ci src[r*w + k, ci] * Wc[co, ci, k]
        y = jnp.broadcast_to(vecs_ref[pl.ds(1 + 3 * i, 1), :], (n_out, c_pad))
        for k in range(w):
            xk = src[pl.ds(k, n_out, stride=w), :].astype(jnp.bfloat16)
            y = y + jnp.dot(xk, wc_ref[i * w + k],
                            preferred_element_type=jnp.float32)

        # BatchNorm1d training-mode batch stats (biased var, eps=1e-5), single pass.
        inv_n = 1.0 / float(n_out)
        mean = jnp.sum(y, axis=0, keepdims=True) * inv_n
        var = jnp.sum(y * y, axis=0, keepdims=True) * inv_n - mean * mean
        var = jnp.maximum(var, 0.0)
        yn = (y - mean) * lax.rsqrt(var + 1e-5)
        yn = yn * vecs_ref[pl.ds(2 + 3 * i, 1), :] + vecs_ref[pl.ds(3 + 3 * i, 1), :]

        # ELU(alpha=1); exp(min(x,0)) keeps the unselected branch finite.
        dst[...] = jnp.where(yn > 0, yn, jnp.exp(jnp.minimum(yn, 0.0)) - 1.0)


# ------------------------------- param prep --------------------------------
def init_params(key, d_model, d_inner, window_size, n_layers=3):
    """PyTorch-layout parameters (W_down is stored (d_model, d_inner))."""
    keys = jax.random.split(key, 2 + 2 * n_layers)
    W_down = jax.random.normal(keys[0], (d_model, d_inner), jnp.float32) * 0.1
    b_down = jax.random.normal(keys[1], (d_inner,), jnp.float32) * 0.1
    conv_params = []
    for i in range(n_layers):
        Wc = jax.random.normal(keys[2 + 2 * i], (d_inner, d_inner, window_size),
                               jnp.float32) * 0.1
        bc = jax.random.normal(keys[3 + 2 * i], (d_inner,), jnp.float32) * 0.1
        gamma = jnp.ones((d_inner,), jnp.float32)   # BatchNorm default affine init
        beta = jnp.zeros((d_inner,), jnp.float32)
        conv_params.append((Wc, bc, gamma, beta))
    return (W_down, b_down, conv_params)


def pack_params(params, window_size, n_layers=3):
    """One-time weight prep: pad channels to the 128-lane width, fold the conv
    weight (co, ci, k) into per-tap (ci, co) matmul matrices, cast MXU operands
    to bf16, stack all per-channel vectors into one (1+3L, C_pad) f32 slab."""
    W_down, b_down, conv_params = params
    d_model, d_inner = W_down.shape
    w = window_size
    k_pad = _round_up(d_model, LANE)
    c_pad = _round_up(d_inner, LANE)

    wd = jnp.zeros((k_pad, c_pad), jnp.float32).at[:d_model, :d_inner].set(W_down)
    wc = jnp.zeros((n_layers * w, c_pad, c_pad), jnp.float32)
    vecs = jnp.zeros((1 + 3 * n_layers, c_pad), jnp.float32)
    vecs = vecs.at[0, :d_inner].set(b_down)
    for i, (Wc, bc, gamma, beta) in enumerate(conv_params):
        for k in range(w):
            wc = wc.at[i * w + k, :d_inner, :d_inner].set(Wc[:, :, k].T)
        vecs = vecs.at[1 + 3 * i, :d_inner].set(bc)
        vecs = vecs.at[2 + 3 * i, :d_inner].set(gamma)
        vecs = vecs.at[3 + 3 * i, :d_inner].set(beta)

    return dict(
        w_down=wd.astype(jnp.bfloat16),
        w_conv=wc.astype(jnp.bfloat16),
        vecs=vecs,
        window_size=w, n_layers=n_layers,
        d_model=d_model, d_inner=d_inner, k_pad=k_pad, c_pad=c_pad,
    )


# ------------------------------ forward pass --------------------------------
def bottleneck_construct_forward(enc_input, packed):
    """enc_input: (B, L, d_model) f32.  Returns the module's `all_inputs`:
    [(B, L, d_inner), (B, L/w, d_inner), (B, L/w^2, d_inner), (B, L/w^3, d_inner)]."""
    B, L, d_model = enc_input.shape
    w, n_layers = packed["window_size"], packed["n_layers"]
    c_pad, k_pad, d_inner = packed["c_pad"], packed["k_pad"], packed["d_inner"]
    assert d_model == packed["d_model"]
    assert L % (w ** n_layers) == 0, "L must be divisible by window_size**n_layers"

    Ts = [L // (w ** i) for i in range(n_layers + 1)]
    Ns = [B * t for t in Ts]

    # pad channel dim to lane width + cast the MXU activation operand to bf16
    x = enc_input.reshape(B * L, d_model)
    x = jnp.pad(x, ((0, 0), (0, k_pad - d_model))).astype(jnp.bfloat16)

    total_bytes = (x.size * 2 + packed["w_down"].size * 2 + packed["w_conv"].size * 2
                   + packed["vecs"].size * 4 + sum(n * c_pad * 4 for n in Ns))
    # TODO(synk): replace with the row-tiled two-pass BN pipeline for larger problems.
    assert total_bytes < 40 * 1024 * 1024, "activations too large for fused VMEM kernel"

    vmem = pl.BlockSpec(memory_space=pltpu.MemorySpace.VMEM)
    outs = pl.pallas_call(
        functools.partial(_fused_kernel, w=w, n_layers=n_layers),
        out_shape=tuple(jax.ShapeDtypeStruct((n, c_pad), jnp.float32) for n in Ns),
        in_specs=[vmem, vmem, vmem, vmem],
        out_specs=tuple([vmem] * (n_layers + 1)),
        compiler_params=pltpu.CompilerParams(
            vmem_limit_bytes=int(max(4 * 1024 * 1024, 2 * total_bytes))),
    )(x, packed["w_down"], packed["w_conv"], packed["vecs"])

    # strip lane padding back to d_inner (layout plumbing only, outside the kernel)
    return [o.reshape(B, Ts[i], c_pad)[:, :, :d_inner] for i, o in enumerate(outs)]


if __name__ == "__main__":
    B, L, d_model, d_inner, window_size = 2, 64, 32, 16, 2   # L divisible by w**3

    key = jax.random.PRNGKey(0)
    k_in, k_par = jax.random.split(key)
    enc_input = jax.random.normal(k_in, (B, L, d_model), jnp.float32)

    params = init_params(k_par, d_model, d_inner, window_size)
    packed = pack_params(params, window_size)          # one-time weight prep

    outs = bottleneck_construct_forward(enc_input, packed)
    for o in outs:
        jax.block_until_ready(o)

    expected_T = [L, L // window_size, L // window_size ** 2, L // window_size ** 3]
    assert [o.shape for o in outs] == [(B, t, d_inner) for t in expected_T]
    assert all(bool(jnp.isfinite(o).all()) for o in outs)
    print("KERNEL_OK")
</pallas_src>

<mosaic_0001>
module attributes {stable_mosaic.version = 11 : i64} {
  func.func @_fused_kernel(%arg0: memref<128x128xbf16, #tpu.memory_space<vmem>>, %arg1: memref<128x128xbf16, #tpu.memory_space<vmem>>, %arg2: memref<6x128x128xbf16, #tpu.memory_space<vmem>>, %arg3: memref<10x128xf32, #tpu.memory_space<vmem>>, %arg4: memref<128x128xf32, #tpu.memory_space<vmem>>, %arg5: memref<64x128xf32, #tpu.memory_space<vmem>>, %arg6: memref<32x128xf32, #tpu.memory_space<vmem>>, %arg7: memref<16x128xf32, #tpu.memory_space<vmem>>) attributes {dimension_semantics = [], scalar_prefetch = 0 : i64, scratch_operands = 0 : i64, tpu.core_type = #tpu.core_type<tc>} {
    %c0 = arith.constant 0 : index
    %c0_0 = arith.constant 0 : index
    %0 = vector.load %arg0[%c0, %c0_0] : memref<128x128xbf16, #tpu.memory_space<vmem>>, vector<128x128xbf16>
    %c0_1 = arith.constant 0 : index
    %c0_2 = arith.constant 0 : index
    %1 = vector.load %arg1[%c0_1, %c0_2] : memref<128x128xbf16, #tpu.memory_space<vmem>>, vector<128x128xbf16>
    %cst = arith.constant dense<0.000000e+00> : vector<128x128xf32>
    %2 = tpu.matmul %0, %1, %cst {dimension_numbers = #tpu.dot_dimension_numbers<[1], [0], [0], [1], [0, 0, 1, 1], [], []>} : vector<128x128xbf16>, vector<128x128xbf16>, vector<128x128xf32> -> vector<128x128xf32>
    %c0_3 = arith.constant 0 : index
    %c0_4 = arith.constant 0 : index
    %3 = vector.load %arg3[%c0_3, %c0_4] : memref<10x128xf32, #tpu.memory_space<vmem>>, vector<1x128xf32>
    %4 = vector.broadcast %3 : vector<1x128xf32> to vector<128x128xf32>
    %5 = arith.addf %2, %4 : vector<128x128xf32>
    %c0_5 = arith.constant 0 : index
    %c0_6 = arith.constant 0 : index
    %6 = vector.load %arg4[%c0_5, %c0_6] : memref<128x128xf32, #tpu.memory_space<vmem>>, vector<128x128xf32>
    tpu.vector_store %arg4[%c0_5, %c0_6], %5 {strides = array<i32>} : memref<128x128xf32, #tpu.memory_space<vmem>>, vector<128x128xf32>,
    %c1 = arith.constant 1 : index
    %c0_7 = arith.constant 0 : index
    %7 = vector.load %arg3[%c1, %c0_7] : memref<10x128xf32, #tpu.memory_space<vmem>>, vector<1x128xf32>
    %8 = vector.shape_cast %7 : vector<1x128xf32> to vector<1x128xf32>
    %9 = vector.broadcast %8 : vector<1x128xf32> to vector<64x128xf32>
    %c0_8 = arith.constant 0 : index
    %c0_9 = arith.constant 0 : index
    %10 = tpu.strided_load %arg4[%c0_8, %c0_9] {strides = array<i32: 2, 1>} : memref<128x128xf32, #tpu.memory_space<vmem>>, vector<64x128xf32>
    %11 = arith.truncf %10 : vector<64x128xf32> to vector<64x128xbf16>
    %c0_10 = arith.constant 0 : index
    %c0_11 = arith.constant 0 : index
    %c0_12 = arith.constant 0 : index
    %12 = vector.load %arg2[%c0_10, %c0_11, %c0_12] : memref<6x128x128xbf16, #tpu.memory_space<vmem>>, vector<1x128x128xbf16>
    %13 = vector.shape_cast %12 : vector<1x128x128xbf16> to vector<128x128xbf16>
    %cst_13 = arith.constant dense<0.000000e+00> : vector<64x128xf32>
    %14 = tpu.matmul %11, %13, %cst_13 {dimension_numbers = #tpu.dot_dimension_numbers<[1], [0], [0], [1], [0, 0, 1, 1], [], []>} : vector<64x128xbf16>, vector<128x128xbf16>, vector<64x128xf32> -> vector<64x128xf32>
    %15 = arith.addf %9, %14 : vector<64x128xf32>
    %c1_14 = arith.constant 1 : index
    %c0_15 = arith.constant 0 : index
    %16 = tpu.strided_load %arg4[%c1_14, %c0_15] {strides = array<i32: 2, 1>} : memref<128x128xf32, #tpu.memory_space<vmem>>, vector<64x128xf32>
    %17 = arith.truncf %16 : vector<64x128xf32> to vector<64x128xbf16>
    %c1_16 = arith.constant 1 : index
    %c0_17 = arith.constant 0 : index
    %c0_18 = arith.constant 0 : index
    %18 = vector.load %arg2[%c1_16, %c0_17, %c0_18] : memref<6x128x128xbf16, #tpu.memory_space<vmem>>, vector<1x128x128xbf16>
    %19 = vector.shape_cast %18 : vector<1x128x128xbf16> to vector<128x128xbf16>
    %cst_19 = arith.constant dense<0.000000e+00> : vector<64x128xf32>
    %20 = tpu.matmul %17, %19, %cst_19 {dimension_numbers = #tpu.dot_dimension_numbers<[1], [0], [0], [1], [0, 0, 1, 1], [], []>} : vector<64x128xbf16>, vector<128x128xbf16>, vector<64x128xf32> -> vector<64x128xf32>
    %21 = arith.addf %15, %20 : vector<64x128xf32>
    %cst_20 = arith.constant dense<0.000000e+00> : vector<128xf32>
    %22 = vector.multi_reduction <add>, %21, %cst_20 [0] : vector<64x128xf32> to vector<128xf32>
    %23 = vector.shape_cast %22 : vector<128xf32> to vector<1x128xf32>
    %cst_21 = arith.constant 1.562500e-02 : f32
    %24 = vector.broadcast %cst_21 : f32 to vector<1x128xf32>
    %25 = arith.mulf %23, %24 : vector<1x128xf32>
    %26 = arith.mulf %21, %21 : vector<64x128xf32>
    %cst_22 = arith.constant dense<0.000000e+00> : vector<128xf32>
    %27 = vector.multi_reduction <add>, %26, %cst_22 [0] : vector<64x128xf32> to vector<128xf32>
    %28 = vector.shape_cast %27 : vector<128xf32> to vector<1x128xf32>
    %cst_23 = arith.constant 1.562500e-02 : f32
    %29 = vector.broadcast %cst_23 : f32 to vector<1x128xf32>
    %30 = arith.mulf %28, %29 : vector<1x128xf32>
    %31 = arith.mulf %25, %25 : vector<1x128xf32>
    %32 = arith.subf %30, %31 : vector<1x128xf32>
    %cst_24 = arith.constant 0.000000e+00 : f32
    %33 = vector.broadcast %cst_24 : f32 to vector<1x128xf32>
    %34 = arith.maximumf %32, %33 : vector<1x128xf32>
    %35 = vector.broadcast %25 : vector<1x128xf32> to vector<64x128xf32>
    %36 = arith.subf %21, %35 : vector<64x128xf32>
    %cst_25 = arith.constant 9.99999974E-6 : f32
    %37 = vector.broadcast %cst_25 : f32 to vector<1x128xf32>
    %38 = arith.addf %34, %37 : vector<1x128xf32>
    %39 = math.rsqrt %38 : vector<1x128xf32>
    %40 = vector.broadcast %39 : vector<1x128xf32> to vector<64x128xf32>
    %41 = arith.mulf %36, %40 : vector<64x128xf32>
    %c2 = arith.constant 2 : index
    %c0_26 = arith.constant 0 : index
    %42 = vector.load %arg3[%c2, %c0_26] : memref<10x128xf32, #tpu.memory_space<vmem>>, vector<1x128xf32>
    %43 = vector.broadcast %42 : vector<1x128xf32> to vector<64x128xf32>
    %44 = arith.mulf %41, %43 : vector<64x128xf32>
    %c3 = arith.constant 3 : index
    %c0_27 = arith.constant 0 : index
    %45 = vector.load %arg3[%c3, %c0_27] : memref<10x128xf32, #tpu.memory_space<vmem>>, vector<1x128xf32>
    %46 = vector.broadcast %45 : vector<1x128xf32> to vector<64x128xf32>
    %47 = arith.addf %44, %46 : vector<64x128xf32>
    %cst_28 = arith.constant 0.000000e+00 : f32
    %48 = vector.broadcast %cst_28 : f32 to vector<64x128xf32>
    %49 = arith.cmpf ogt, %47, %48 : vector<64x128xf32>
    %cst_29 = arith.constant 0.000000e+00 : f32
    %50 = vector.broadcast %cst_29 : f32 to vector<64x128xf32>
    %51 = arith.minimumf %47, %50 : vector<64x128xf32>
    %52 = math.exp %51 : vector<64x128xf32>
    %cst_30 = arith.constant 1.000000e+00 : f32
    %53 = vector.broadcast %cst_30 : f32 to vector<64x128xf32>
    %54 = arith.subf %52, %53 : vector<64x128xf32>
    %55 = arith.select %49, %47, %54 : vector<64x128xi1>, vector<64x128xf32>
    %c0_31 = arith.constant 0 : index
    %c0_32 = arith.constant 0 : index
    %56 = vector.load %arg5[%c0_31, %c0_32] : memref<64x128xf32, #tpu.memory_space<vmem>>, vector<64x128xf32>
    tpu.vector_store %arg5[%c0_31, %c0_32], %55 {strides = array<i32>} : memref<64x128xf32, #tpu.memory_space<vmem>>, vector<64x128xf32>,
    %c4 = arith.constant 4 : index
    %c0_33 = arith.constant 0 : index
    %57 = vector.load %arg3[%c4, %c0_33] : memref<10x128xf32, #tpu.memory_space<vmem>>, vector<1x128xf32>
    %58 = vector.shape_cast %57 : vector<1x128xf32> to vector<1x128xf32>
    %59 = vector.broadcast %58 : vector<1x128xf32> to vector<32x128xf32>
    %c0_34 = arith.constant 0 : index
    %c0_35 = arith.constant 0 : index
    %60 = tpu.strided_load %arg5[%c0_34, %c0_35] {strides = array<i32: 2, 1>} : memref<64x128xf32, #tpu.memory_space<vmem>>, vector<32x128xf32>
    %61 = arith.truncf %60 : vector<32x128xf32> to vector<32x128xbf16>
    %c2_36 = arith.constant 2 : index
    %c0_37 = arith.constant 0 : index
    %c0_38 = arith.constant 0 : index
    %62 = vector.load %arg2[%c2_36, %c0_37, %c0_38] : memref<6x128x128xbf16, #tpu.memory_space<vmem>>, vector<1x128x128xbf16>
    %63 = vector.shape_cast %62 : vector<1x128x128xbf16> to vector<128x128xbf16>
    %cst_39 = arith.constant dense<0.000000e+00> : vector<32x128xf32>
    %64 = tpu.matmul %61, %63, %cst_39 {dimension_numbers = #tpu.dot_dimension_numbers<[1], [0], [0], [1], [0, 0, 1, 1], [], []>} : vector<32x128xbf16>, vector<128x128xbf16>, vector<32x128xf32> -> vector<32x128xf32>
    %65 = arith.addf %59, %64 : vector<32x128xf32>
    %c1_40 = arith.constant 1 : index
    %c0_41 = arith.constant 0 : index
    %66 = tpu.strided_load %arg5[%c1_40, %c0_41] {strides = array<i32: 2, 1>} : memref<64x128xf32, #tpu.memory_space<vmem>>, vector<32x128xf32>
    %67 = arith.truncf %66 : vector<32x128xf32> to vector<32x128xbf16>
    %c3_42 = arith.constant 3 : index
    %c0_43 = arith.constant 0 : index
    %c0_44 = arith.constant 0 : index
    %68 = vector.load %arg2[%c3_42, %c0_43, %c0_44] : memref<6x128x128xbf16, #tpu.memory_space<vmem>>, vector<1x128x128xbf16>
    %69 = vector.shape_cast %68 : vector<1x128x128xbf16> to vector<128x128xbf16>
    %cst_45 = arith.constant dense<0.000000e+00> : vector<32x128xf32>
    %70 = tpu.matmul %67, %69, %cst_45 {dimension_numbers = #tpu.dot_dimension_numbers<[1], [0], [0], [1], [0, 0, 1, 1], [], []>} : vector<32x128xbf16>, vector<128x128xbf16>, vector<32x128xf32> -> vector<32x128xf32>
    %71 = arith.addf %65, %70 : vector<32x128xf32>
    %cst_46 = arith.constant dense<0.000000e+00> : vector<128xf32>
    %72 = vector.multi_reduction <add>, %71, %cst_46 [0] : vector<32x128xf32> to vector<128xf32>
    %73 = vector.shape_cast %72 : vector<128xf32> to vector<1x128xf32>
    %cst_47 = arith.constant 3.125000e-02 : f32
    %74 = vector.broadcast %cst_47 : f32 to vector<1x128xf32>
    %75 = arith.mulf %73, %74 : vector<1x128xf32>
    %76 = arith.mulf %71, %71 : vector<32x128xf32>
    %cst_48 = arith.constant dense<0.000000e+00> : vector<128xf32>
    %77 = vector.multi_reduction <add>, %76, %cst_48 [0] : vector<32x128xf32> to vector<128xf32>
    %78 = vector.shape_cast %77 : vector<128xf32> to vector<1x128xf32>
    %cst_49 = arith.constant 3.125000e-02 : f32
    %79 = vector.broadcast %cst_49 : f32 to vector<1x128xf32>
    %80 = arith.mulf %78, %79 : vector<1x128xf32>
    %81 = arith.mulf %75, %75 : vector<1x128xf32>
    %82 = arith.subf %80, %81 : vector<1x128xf32>
    %cst_50 = arith.constant 0.000000e+00 : f32
    %83 = vector.broadcast %cst_50 : f32 to vector<1x128xf32>
    %84 = arith.maximumf %82, %83 : vector<1x128xf32>
    %85 = vector.broadcast %75 : vector<1x128xf32> to vector<32x128xf32>
    %86 = arith.subf %71, %85 : vector<32x128xf32>
    %cst_51 = arith.constant 9.99999974E-6 : f32
    %87 = vector.broadcast %cst_51 : f32 to vector<1x128xf32>
    %88 = arith.addf %84, %87 : vector<1x128xf32>
    %89 = math.rsqrt %88 : vector<1x128xf32>
    %90 = vector.broadcast %89 : vector<1x128xf32> to vector<32x128xf32>
    %91 = arith.mulf %86, %90 : vector<32x128xf32>
    %c5 = arith.constant 5 : index
    %c0_52 = arith.constant 0 : index
    %92 = vector.load %arg3[%c5, %c0_52] : memref<10x128xf32, #tpu.memory_space<vmem>>, vector<1x128xf32>
    %93 = vector.broadcast %92 : vector<1x128xf32> to vector<32x128xf32>
    %94 = arith.mulf %91, %93 : vector<32x128xf32>
    %c6 = arith.constant 6 : index
    %c0_53 = arith.constant 0 : index
    %95 = vector.load %arg3[%c6, %c0_53] : memref<10x128xf32, #tpu.memory_space<vmem>>, vector<1x128xf32>
    %96 = vector.broadcast %95 : vector<1x128xf32> to vector<32x128xf32>
    %97 = arith.addf %94, %96 : vector<32x128xf32>
    %cst_54 = arith.constant 0.000000e+00 : f32
    %98 = vector.broadcast %cst_54 : f32 to vector<32x128xf32>
    %99 = arith.cmpf ogt, %97, %98 : vector<32x128xf32>
    %cst_55 = arith.constant 0.000000e+00 : f32
    %100 = vector.broadcast %cst_55 : f32 to vector<32x128xf32>
    %101 = arith.minimumf %97, %100 : vector<32x128xf32>
    %102 = math.exp %101 : vector<32x128xf32>
    %cst_56 = arith.constant 1.000000e+00 : f32
    %103 = vector.broadcast %cst_56 : f32 to vector<32x128xf32>
    %104 = arith.subf %102, %103 : vector<32x128xf32>
    %105 = arith.select %99, %97, %104 : vector<32x128xi1>, vector<32x128xf32>
    %c0_57 = arith.constant 0 : index
    %c0_58 = arith.constant 0 : index
    %106 = vector.load %arg6[%c0_57, %c0_58] : memref<32x128xf32, #tpu.memory_space<vmem>>, vector<32x128xf32>
    tpu.vector_store %arg6[%c0_57, %c0_58], %105 {strides = array<i32>} : memref<32x128xf32, #tpu.memory_space<vmem>>, vector<32x128xf32>,
    %c7 = arith.constant 7 : index
    %c0_59 = arith.constant 0 : index
    %107 = vector.load %arg3[%c7, %c0_59] : memref<10x128xf32, #tpu.memory_space<vmem>>, vector<1x128xf32>
    %108 = vector.shape_cast %107 : vector<1x128xf32> to vector<1x128xf32>
    %109 = vector.broadcast %108 : vector<1x128xf32> to vector<16x128xf32>
    %c0_60 = arith.constant 0 : index
    %c0_61 = arith.constant 0 : index
    %110 = tpu.strided_load %arg6[%c0_60, %c0_61] {strides = array<i32: 2, 1>} : memref<32x128xf32, #tpu.memory_space<vmem>>, vector<16x128xf32>
    %111 = arith.truncf %110 : vector<16x128xf32> to vector<16x128xbf16>
    %c4_62 = arith.constant 4 : index
    %c0_63 = arith.constant 0 : index
    %c0_64 = arith.constant 0 : index
    %112 = vector.load %arg2[%c4_62, %c0_63, %c0_64] : memref<6x128x128xbf16, #tpu.memory_space<vmem>>, vector<1x128x128xbf16>
    %113 = vector.shape_cast %112 : vector<1x128x128xbf16> to vector<128x128xbf16>
    %cst_65 = arith.constant dense<0.000000e+00> : vector<16x128xf32>
    %114 = tpu.matmul %111, %113, %cst_65 {dimension_numbers = #tpu.dot_dimension_numbers<[1], [0], [0], [1], [0, 0, 1, 1], [], []>} : vector<16x128xbf16>, vector<128x128xbf16>, vector<16x128xf32> -> vector<16x128xf32>
    %115 = arith.addf %109, %114 : vector<16x128xf32>
    %c1_66 = arith.constant 1 : index
    %c0_67 = arith.constant 0 : index
    %116 = tpu.strided_load %arg6[%c1_66, %c0_67] {strides = array<i32: 2, 1>} : memref<32x128xf32, #tpu.memory_space<vmem>>, vector<16x128xf32>
    %117 = arith.truncf %116 : vector<16x128xf32> to vector<16x128xbf16>
    %c5_68 = arith.constant 5 : index
    %c0_69 = arith.constant 0 : index
    %c0_70 = arith.constant 0 : index
    %118 = vector.load %arg2[%c5_68, %c0_69, %c0_70] : memref<6x128x128xbf16, #tpu.memory_space<vmem>>, vector<1x128x128xbf16>
    %119 = vector.shape_cast %118 : vector<1x128x128xbf16> to vector<128x128xbf16>
    %cst_71 = arith.constant dense<0.000000e+00> : vector<16x128xf32>
    %120 = tpu.matmul %117, %119, %cst_71 {dimension_numbers = #tpu.dot_dimension_numbers<[1], [0], [0], [1], [0, 0, 1, 1], [], []>} : vector<16x128xbf16>, vector<128x128xbf16>, vector<16x128xf32> -> vector<16x128xf32>
    %121 = arith.addf %115, %120 : vector<16x128xf32>
    %cst_72 = arith.constant dense<0.000000e+00> : vector<128xf32>
    %122 = vector.multi_reduction <add>, %121, %cst_72 [0] : vector<16x128xf32> to vector<128xf32>
    %123 = vector.shape_cast %122 : vector<128xf32> to vector<1x128xf32>
    %cst_73 = arith.constant 6.250000e-02 : f32
    %124 = vector.broadcast %cst_73 : f32 to vector<1x128xf32>
    %125 = arith.mulf %123, %124 : vector<1x128xf32>
    %126 = arith.mulf %121, %121 : vector<16x128xf32>
    %cst_74 = arith.constant dense<0.000000e+00> : vector<128xf32>
    %127 = vector.multi_reduction <add>, %126, %cst_74 [0] : vector<16x128xf32> to vector<128xf32>
    %128 = vector.shape_cast %127 : vector<128xf32> to vector<1x128xf32>
    %cst_75 = arith.constant 6.250000e-02 : f32
    %129 = vector.broadcast %cst_75 : f32 to vector<1x128xf32>
    %130 = arith.mulf %128, %129 : vector<1x128xf32>
    %131 = arith.mulf %125, %125 : vector<1x128xf32>
    %132 = arith.subf %130, %131 : vector<1x128xf32>
    %cst_76 = arith.constant 0.000000e+00 : f32
    %133 = vector.broadcast %cst_76 : f32 to vector<1x128xf32>
    %134 = arith.maximumf %132, %133 : vector<1x128xf32>
    %135 = vector.broadcast %125 : vector<1x128xf32> to vector<16x128xf32>
    %136 = arith.subf %121, %135 : vector<16x128xf32>
    %cst_77 = arith.constant 9.99999974E-6 : f32
    %137 = vector.broadcast %cst_77 : f32 to vector<1x128xf32>
    %138 = arith.addf %134, %137 : vector<1x128xf32>
    %139 = math.rsqrt %138 : vector<1x128xf32>
    %140 = vector.broadcast %139 : vector<1x128xf32> to vector<16x128xf32>
    %141 = arith.mulf %136, %140 : vector<16x128xf32>
    %c8 = arith.constant 8 : index
    %c0_78 = arith.constant 0 : index
    %142 = vector.load %arg3[%c8, %c0_78] : memref<10x128xf32, #tpu.memory_space<vmem>>, vector<1x128xf32>
    %143 = vector.broadcast %142 : vector<1x128xf32> to vector<16x128xf32>
    %144 = arith.mulf %141, %143 : vector<16x128xf32>
    %c9 = arith.constant 9 : index
    %c0_79 = arith.constant 0 : index
    %145 = vector.load %arg3[%c9, %c0_79] : memref<10x128xf32, #tpu.memory_space<vmem>>, vector<1x128xf32>
    %146 = vector.broadcast %145 : vector<1x128xf32> to vector<16x128xf32>
    %147 = arith.addf %144, %146 : vector<16x128xf32>
    %cst_80 = arith.constant 0.000000e+00 : f32
    %148 = vector.broadcast %cst_80 : f32 to vector<16x128xf32>
    %149 = arith.cmpf ogt, %147, %148 : vector<16x128xf32>
    %cst_81 = arith.constant 0.000000e+00 : f32
    %150 = vector.broadcast %cst_81 : f32 to vector<16x128xf32>
    %151 = arith.minimumf %147, %150 : vector<16x128xf32>
    %152 = math.exp %151 : vector<16x128xf32>
    %cst_82 = arith.constant 1.000000e+00 : f32
    %153 = vector.broadcast %cst_82 : f32 to vector<16x128xf32>
    %154 = arith.subf %152, %153 : vector<16x128xf32>
    %155 = arith.select %149, %147, %154 : vector<16x128xi1>, vector<16x128xf32>
    %c0_83 = arith.constant 0 : index
    %c0_84 = arith.constant 0 : index
    %156 = vector.load %arg7[%c0_83, %c0_84] : memref<16x128xf32, #tpu.memory_space<vmem>>, vector<16x128xf32>
    tpu.vector_store %arg7[%c0_83, %c0_84], %155 {strides = array<i32>} : memref<16x128xf32, #tpu.memory_space<vmem>>, vector<16x128xf32>,
    return
  }
}

</mosaic_0001>

<bundles_post_ra>
// kernel: tpu_custom_call.1
= control target key start
LH: loop header
LB: loop body
LE: loop exit
PB: predicated region body
PF: predicated region fallthrough
CT: control target
= control target key end

     0   :  { %13 = vsyncpa [#allocation3], 0  ;;  %s2064_s0 = inlined_call_operand.hbm [shape: bf16[128,128], index: 0, kind: input, shape index: {}]   ;;  %s2065_s1 = inlined_call_operand.hbm [shape: bf16[128,128], index: 1, kind: input, shape index: {}]   ;;  %s2066_s2 = inlined_call_operand.hbm [shape: bf16[6,128,128], index: 2, kind: input, shape index: {}]   ;;  %s2067_s3 = inlined_call_operand.hbm [shape: f32[10,128], index: 3, kind: input, shape index: {}]   ;;  %s2068_s4 = inlined_call_operand.hbm [shape: f32[128,128], index: 4, kind: output, shape index: {0}]   ;;  %s2069_s5 = inlined_call_operand.hbm [shape: f32[64,128], index: 5, kind: output, shape index: {1}]   ;;  %s2070_s6 = inlined_call_operand.hbm [shape: f32[32,128], index: 6, kind: output, shape index: {2}]   ;;  %s2071_s7 = inlined_call_operand.hbm [shape: f32[16,128], index: 7, kind: output, shape index: {3}]  }
   0x1   :  { %14 = vsyncpa [#allocation6], 0 }
   0x2   :  { %15 = vsyncpa [#allocation9], 0 }
   0x3   :  { %16 = vsyncpa [#allocation4], 0 }
   0x4   :  { %17 = vsyncpa [#allocation12], 0 }
   0x5   :  { %18 = vsyncpa [#allocation15], 0  ;;  %s36_s26 = sshll.u32 %s2065_s1, 4  ;;  %s1858_s27 = smov [#allocation5]   ;;  %s37_s26 = int_to_ptr.hbm [resolvable:$true] %s36_s26 }
   0x6   :  { %s38_s28 = sshll.u32 %s1858_s27, 4  ;;  %s23_s8 = sshll.u32 %s2064_s0, 4  ;;  %s39_s28 = int_to_ptr.vmem [resolvable:$true] %s38_s28  ;;  %s24_s8 = int_to_ptr.hbm [resolvable:$true] %s23_s8 }
   0x7   :  { %s1859_s9 = smov 64   ;;  %s1860_s10 = smov 4  }
   0x8   :  { %44 = dma.hbm_to_vmem [thread:$0]  %s37_s26, 1024, %s39_s28, [#allocation6], %s1859_s9, %s1859_s9, %s1860_s10  }
   0x9   :  { %s1861_s11 = smov [#allocation2]   ;;  %s49_s15 = sshll.u32 %s2066_s2, 4  ;;  %s50_s15 = int_to_ptr.hbm [resolvable:$true] %s49_s15 }
   0xa   :  { %s25_s12 = sshll.u32 %s1861_s11, 4  ;;  %s62_s17 = sshll.u32 %s2067_s3, 4  ;;  %s26_s12 = int_to_ptr.vmem [resolvable:$true] %s25_s12  ;;  %s63_s17 = int_to_ptr.hbm [resolvable:$true] %s62_s17 }
   0xb   :  { %31 = dma.hbm_to_vmem [thread:$0]  %s24_s8, 1024, %s26_s12, [#allocation3], %s1859_s9, %s1859_s9, %s1860_s10  }
   0xc   :  { %s1862_s18 = smov [#allocation7]   ;;  %s1863_s0 = smov [#allocation8]  }
   0xd   :  { %s51_s19 = sshll.u32 %s1862_s18, 4  ;;  %s64_s20 = sshll.u32 %s1863_s0, 4  ;;  %s52_s19 = int_to_ptr.vmem [resolvable:$true] %s51_s19  ;;  %s65_s20 = int_to_ptr.vmem [resolvable:$true] %s64_s20 }
   0xe   :  { %57 = dma.hbm_to_vmem [thread:$0]  %s50_s15, 6144, %s52_s19, [#allocation6], %s1859_s9, %s1859_s9, %s1860_s10  }
   0xf   :  { %s1864_s21 = smov 128   ;;  %s1865_s22 = smov 8  }
  0x10   :  { %70 = dma.hbm_to_vmem [thread:$0]  %s63_s17, 256, %s65_s20, [#allocation9], %s1864_s21, %s1864_s21, %s1865_s22  }
  0x11   :  { %1846 = dma.done.wait [#allocation3], 1024  }
  0x12   :  { %1847 = vsyncadd [#allocation3], 4294966272 }
  0x13   :  { %1848 = dma.done.wait [#allocation6], 7168  }
  0x14   :  { %1849 = vsyncadd [#allocation6], 4294960128 }
  0x15   :  { %1850 = dma.done.wait [#allocation9], 256  }
  0x16   :  { %1851 = vsyncadd [#allocation9], 4294967040  ;;  %v1541_v0 = vld [vmem:[#allocation5 + $0x38] sm:$0xff]  ;;  %v1540_v1 = vld [vmem:[#allocation5 + $0x30] sm:$0xff]  ;;  %s1201_s23 = sshll.u32 %s2069_s5, 4  ;;  %s1866_s24 = smov [#allocation11]   ;;  %s1202_s23 = int_to_ptr.hbm [resolvable:$true] %s1201_s23 }
  0x17   :  { %217 = vmatpush.bf16.msra.mxu0 %v1541_v0  ;;  %1590 = vmatpush.bf16.msra.mxu3 %v1541_v0  ;;  %v1539_v2 = vld [vmem:[#allocation5 + $0x28] sm:$0xff]  ;;  %v1538_v3 = vld [vmem:[#allocation5 + $0x20] sm:$0xff]  ;;  %v1537_v4 = vld [vmem:[#allocation5 + $0x18] sm:$0xff]  ;;  %s1199_s25 = sshll.u32 %s1866_s24, 4  ;;  %s1867_s26 = smov [#allocation10]   ;;  %s1200_s25 = int_to_ptr.vmem [resolvable:$true] %s1199_s25 }
  0x18   :  { %v1536_v5 = vld [vmem:[#allocation5 + $0x10] sm:$0xff]  ;;  %v1535_v6 = vld [vmem:[#allocation5 + $0x8] sm:$0xff]  ;;  %v1534_v7 = vld [vmem:[#allocation5] sm:$0xff]  ;;  %s1186_s27 = sshll.u32 %s1867_s26, 4  ;;  %s1188_s30 = sshll.u32 %s2068_s4, 4  ;;  %s1187_s27 = int_to_ptr.vmem [resolvable:$true] %s1186_s27  ;;  %s1189_s30 = int_to_ptr.hbm [resolvable:$true] %s1188_s30 }
  0x19   :  { %v1526_v8 = vld [vmem:[#allocation2] sm:$0xff]  ;;  %v1527_v9 = vld [vmem:[#allocation2 + $0x8] sm:$0xff]  ;;  %v1532_v10 = vld [vmem:[#allocation2 + $0x30] sm:$0xff]  ;;  %s1214_s9 = sshll.u32 %s2070_s6, 4  ;;  %s1868_s10 = smov [#allocation13]   ;;  %s1215_s9 = int_to_ptr.hbm [resolvable:$true] %s1214_s9 }
  0x1a   :  { %v1528_v11 = vld [vmem:[#allocation2 + $0x10] sm:$0xff]  ;;  %v1533_v12 = vld [vmem:[#allocation2 + $0x38] sm:$0xff]  ;;  %v1530_v14 = vld [vmem:[#allocation2 + $0x20] sm:$0xff]  ;;  %s1212_s11 = sshll.u32 %s1868_s10, 4  ;;  %s1869_s4 = smov [#allocation14]   ;;  %s1213_s11 = int_to_ptr.vmem [resolvable:$true] %s1212_s11 }
  0x1b   :  { %218 = vmatpush.bf16.msra.mxu0 %v1540_v1  ;;  %1591 = vmatpush.bf16.msra.mxu3 %v1540_v1  ;;  %v1529_v13 = vld [vmem:[#allocation2 + $0x18] sm:$0xff]  ;;  %v1531_v15 = vld [vmem:[#allocation2 + $0x28] sm:$0xff]  ;;  %v1548_v18 = vld [vmem:[#allocation7 + $0x30] sm:$0xff]  ;;  %s1225_s6 = sshll.u32 %s1869_s4, 4  ;;  %s1227_s14 = sshll.u32 %s2071_s7, 4  ;;  %s1226_s6 = int_to_ptr.vmem [resolvable:$true] %s1225_s6  ;;  %s1228_s14 = int_to_ptr.hbm [resolvable:$true] %s1227_s14 }
  0x1c   :  { %v1549_v16 = vld [vmem:[#allocation7 + $0x38] sm:$0xff]  ;;  %v1556_v19 = vld [vmem:[#allocation7 + $0x70] sm:$0xff]  ;;  %v1547_v20 = vld [vmem:[#allocation7 + $0x28] sm:$0xff] }
  0x1d   :  { %v1557_v17 = vld [vmem:[#allocation7 + $0x78] sm:$0xff]  ;;  %367 = vmatpush.bf16.msra.mxu1 %v1549_v16  ;;  %v1555_v21 = vld [vmem:[#allocation7 + $0x68] sm:$0xff]  ;;  %v1546_v22 = vld [vmem:[#allocation7 + $0x20] sm:$0xff] }
  0x1e   :  { %489 = vmatpush.bf16.msra.mxu2 %v1557_v17  ;;  %v1554_v23 = vld [vmem:[#allocation7 + $0x60] sm:$0xff]  ;;  %v1545_v24 = vld [vmem:[#allocation7 + $0x18] sm:$0xff]  ;;  %v1544_v26 = vld [vmem:[#allocation7 + $0x10] sm:$0xff] }
  0x1f   :  { %219 = vmatpush.bf16.msra.mxu0 %v1539_v2  ;;  %1592 = vmatpush.bf16.msra.mxu3 %v1539_v2  ;;  %v1553_v25 = vld [vmem:[#allocation7 + $0x58] sm:$0xff]  ;;  %v1552_v27 = vld [vmem:[#allocation7 + $0x50] sm:$0xff]  ;;  %v1543_v28 = vld [vmem:[#allocation7 + $0x8] sm:$0xff] }
  0x20   :  { %v1551_v29 = vld [vmem:[#allocation7 + $0x48] sm:$0xff]  ;;  %v1925_v30 = vld [vmem:[#allocation8] ss:$0 sm:$0xff] }
  0x21   :  { %368 = vmatpush.bf16.msra.mxu1 %v1548_v18  ;;  %v1542_v32 = vld [vmem:[#allocation7] sm:$0xff] }
  0x22   :  { %490 = vmatpush.bf16.msra.mxu2 %v1556_v19  ;;  %v1550_v33 = vld [vmem:[#allocation7 + $0x40] sm:$0xff] }
  0x23   :  { %220 = vmatpush.bf16.msra.mxu0 %v1538_v3  ;;  %1593 = vmatpush.bf16.msra.mxu3 %v1538_v3 }
  0x25   :  { %369 = vmatpush.bf16.msra.mxu1 %v1547_v20 }
  0x26   :  { %491 = vmatpush.bf16.msra.mxu2 %v1555_v21 }
  0x27   :  { %221 = vmatpush.bf16.msra.mxu0 %v1537_v4  ;;  %1594 = vmatpush.bf16.msra.mxu3 %v1537_v4 }
  0x29   :  { %370 = vmatpush.bf16.msra.mxu1 %v1546_v22 }
  0x2a   :  { %492 = vmatpush.bf16.msra.mxu2 %v1554_v23 }
  0x2b   :  { %222 = vmatpush.bf16.msra.mxu0 %v1536_v5  ;;  %1595 = vmatpush.bf16.msra.mxu3 %v1536_v5 }
  0x2d   :  { %371 = vmatpush.bf16.msra.mxu1 %v1545_v24 }
  0x2e   :  { %493 = vmatpush.bf16.msra.mxu2 %v1553_v25 }
  0x2f   :  { %223 = vmatpush.bf16.msra.mxu0 %v1535_v6  ;;  %1596 = vmatpush.bf16.msra.mxu3 %v1535_v6 }
  0x31   :  { %372 = vmatpush.bf16.msra.mxu1 %v1544_v26 }
  0x32   :  { %494 = vmatpush.bf16.msra.mxu2 %v1552_v27 }
  0x33   :  { %224 = vmatpush.bf16.msra.mxu0 %v1534_v7  ;;  %1597 = vmatpush.bf16.msra.mxu3 %v1534_v7 }
  0x35   :  { %373 = vmatpush.bf16.msra.mxu1 %v1543_v28 }
  0x36   :  { %225 = vmatmul.bf16.vlgmr.msra.gmra.mxu0 %v1526_v8  ;;  %255 = vmatmul.bf16.vlgmr.msra.gmra.mxu3 %v1532_v10 }
  0x37   :  { %495 = vmatpush.bf16.msra.mxu2 %v1551_v29 }
  0x39   :  { %374 = vmatpush.bf16.msra.mxu1 %v1542_v32 }
  0x3b   :  { %496 = vmatpush.bf16.msra.mxu2 %v1550_v33 }
  0x46   :  { %230 = vmatmul.bf16.gmra.mxu0 %v1527_v9  ;;  %260 = vmatmul.bf16.gmra.mxu3 %v1533_v12 }
  0x56   :  { %235 = vmatmul.bf16.gmra.mxu0 %v1528_v11 }
  0x66   :  { %240 = vmatmul.bf16.gmra.mxu0 %v1529_v13 }
  0x76   :  { %245 = vmatmul.bf16.gmra.mxu0 %v1530_v14 }
  0x86   :  { %250 = vmatmul.bf16.gmra.mxu0 %v1531_v15 }
  0xb3   :  { %v226_v31 = vpop.f32.mrf.mxu0 }
  0xb4   :  { %v227_v34 = vadd.f32 %v1925_v30, %v226_v31 }
  0xb6   :  { %266 = vst [vmem:[#allocation10] sm:$0xff] %v227_v34 }
  0xb9   :  { %v256_v40 = vpop.f32.mrf.mxu3 }
  0xba   :  { %v257_v42 = vadd.f32 %v1925_v30, %v256_v40 }
  0xbb   :  { %v228_v35 = vpop.f32.mrf.mxu0 }
  0xbc   :  { %v229_v36 = vadd.f32 %v1925_v30, %v228_v35  ;;  %278 = vst [vmem:[#allocation10 + $0x60] sm:$0xff] %v257_v42 }
  0xbe   :  { %267 = vst [vmem:[#allocation10 + $0x8] sm:$0xff] %v229_v36  ;;  %v1611_v36 = vld [vmem:[#allocation8 + $0x1] ss:$0 sm:$0xff] }
  0xc1   :  { %v258_v44 = vpop.f32.mrf.mxu3 }
  0xc2   :  { %v259_v52 = vadd.f32 %v1925_v30, %v258_v44 }
  0xc3   :  { %v231_v37 = vpop.f32.mrf.mxu0 }
  0xc4   :  { %v232_v38 = vadd.f32 %v1925_v30, %v231_v37  ;;  %279 = vst [vmem:[#allocation10 + $0x68] sm:$0xff] %v259_v52 }
  0xc5   :  { %v284_v46 = vld [vmem:[#allocation10] ss:$2 sm:$0xff]  ;;  %v405_v48 = vld [vmem:[#allocation10 + $0x1] ss:$2 sm:$0xff] }
  0xc6   :  { %268 = vst [vmem:[#allocation10 + $0x10] sm:$0xff] %v232_v38 }
  0xc9   :  { %v261_v54 = vpop.f32.mrf.mxu3 }
  0xca   :  { %v262_v56 = vadd.f32 %v1925_v30, %v261_v54 }
  0xcb   :  { %v233_v39 = vpop.f32.mrf.mxu0  ;;  %v296_v19 = vld [vmem:[#allocation10 + $0x60] ss:$2 sm:$0xff]  ;;  %v417_v21 = vld [vmem:[#allocation10 + $0x61] ss:$2 sm:$0xff] }
  0xcc   :  { %v234_v41 = vadd.f32 %v1925_v30, %v233_v39  ;;  %280 = vst [vmem:[#allocation10 + $0x70] sm:$0xff] %v262_v56 }
  0xce   :  { %269 = vst [vmem:[#allocation10 + $0x18] sm:$0xff] %v234_v41 }
  0xd1   :  { %v263_v58 = vpop.f32.mrf.mxu3 }
  0xd2   :  { %v264_v60 = vadd.f32 %v1925_v30, %v263_v58 }
  0xd3   :  { %v236_v43 = vpop.f32.mrf.mxu0 }
  0xd4   :  { %v237_v45 = vadd.f32 %v1925_v30, %v236_v43  ;;  %281 = vst [vmem:[#allocation10 + $0x78] sm:$0xff] %v264_v60 }
  0xd5   :  { %v286_v47 = vld [vmem:[#allocation10 + $0x10] ss:$2 sm:$0xff]  ;;  %v407_v49 = vld [vmem:[#allocation10 + $0x11] ss:$2 sm:$0xff] }
  0xd6   :  { %270 = vst [vmem:[#allocation10 + $0x20] sm:$0xff] %v237_v45  ;;  %v299_v50 = vpack.c.bf16 %v286_v47, %v284_v46  ;;  %v420_v51 = vpack.c.bf16 %v407_v49, %v405_v48 }
  0xd8   :  { %375 = vmatmul.bf16.vlgmr.msra.gmra.mxu1 %v299_v50  ;;  %497 = vmatmul.bf16.vlgmr.msra.gmra.mxu2 %v420_v51 }
  0xdb   :  { %v238_v53 = vpop.f32.mrf.mxu0  ;;  %v298_v20 = vld [vmem:[#allocation10 + $0x70] ss:$2 sm:$0xff]  ;;  %v419_v22 = vld [vmem:[#allocation10 + $0x71] ss:$2 sm:$0xff] }
  0xdc   :  { %v239_v55 = vadd.f32 %v1925_v30, %v238_v53  ;;  %v302_v23 = vpack.c.bf16 %v298_v20, %v296_v19  ;;  %v423_v24 = vpack.c.bf16 %v419_v22, %v417_v21 }
  0xde   :  { %271 = vst [vmem:[#allocation10 + $0x28] sm:$0xff] %v239_v55 }
  0xe3   :  { %v241_v57 = vpop.f32.mrf.mxu0 }
  0xe4   :  { %v242_v59 = vadd.f32 %v1925_v30, %v241_v57 }
  0xe5   :  { %v288_v1 = vld [vmem:[#allocation10 + $0x20] ss:$2 sm:$0xff]  ;;  %v409_v3 = vld [vmem:[#allocation10 + $0x21] ss:$2 sm:$0xff] }
  0xe6   :  { %272 = vst [vmem:[#allocation10 + $0x30] sm:$0xff] %v242_v59 }
  0xeb   :  { %v243_v61 = vpop.f32.mrf.mxu0 }
  0xec   :  { %v244_v62 = vadd.f32 %v1925_v30, %v243_v61 }
  0xee   :  { %273 = vst [vmem:[#allocation10 + $0x38] sm:$0xff] %v244_v62 }
  0xf3   :  { %v246_v63 = vpop.f32.mrf.mxu0 }
  0xf4   :  { %v247_v0 = vadd.f32 %v1925_v30, %v246_v63 }
  0xf5   :  { %v290_v2 = vld [vmem:[#allocation10 + $0x30] ss:$2 sm:$0xff]  ;;  %v411_v4 = vld [vmem:[#allocation10 + $0x31] ss:$2 sm:$0xff] }
  0xf6   :  { %274 = vst [vmem:[#allocation10 + $0x40] sm:$0xff] %v247_v0  ;;  %v300_v5 = vpack.c.bf16 %v290_v2, %v288_v1  ;;  %v421_v6 = vpack.c.bf16 %v411_v4, %v409_v3 }
  0xf8   :  { %380 = vmatmul.bf16.gmra.mxu1 %v300_v5  ;;  %502 = vmatmul.bf16.gmra.mxu2 %v421_v6 }
  0xfb   :  { %v248_v7 = vpop.f32.mrf.mxu0 }
  0xfc   :  { %v249_v8 = vadd.f32 %v1925_v30, %v248_v7 }
  0xfe   :  { %275 = vst [vmem:[#allocation10 + $0x48] sm:$0xff] %v249_v8 }
 0x103   :  { %v251_v9 = vpop.f32.mrf.mxu0 }
 0x104   :  { %v252_v10 = vadd.f32 %v1925_v30, %v251_v9 }
 0x105   :  { %v292_v13 = vld [vmem:[#allocation10 + $0x40] ss:$2 sm:$0xff]  ;;  %v413_v15 = vld [vmem:[#allocation10 + $0x41] ss:$2 sm:$0xff] }
 0x106   :  { %276 = vst [vmem:[#allocation10 + $0x50] sm:$0xff] %v252_v10 }
 0x10b   :  { %v253_v11 = vpop.f32.mrf.mxu0 }
 0x10c   :  { %v254_v12 = vadd.f32 %v1925_v30, %v253_v11 }
 0x10e   :  { %277 = vst [vmem:[#allocation10 + $0x58] sm:$0xff] %v254_v12 }
 0x10f   :  { %1194 = dma.vmem_to_hbm [thread:$0]  %s1187_s27, 2048, %s1189_s30, [#allocation4], %s1864_s21, %s1864_s21, %s1865_s22  }
 0x115   :  { %v294_v14 = vld [vmem:[#allocation10 + $0x50] ss:$2 sm:$0xff]  ;;  %v415_v16 = vld [vmem:[#allocation10 + $0x51] ss:$2 sm:$0xff] }
 0x116   :  { %v301_v17 = vpack.c.bf16 %v294_v14, %v292_v13  ;;  %v422_v18 = vpack.c.bf16 %v415_v16, %v413_v15 }
 0x118   :  { %385 = vmatmul.bf16.gmra.mxu1 %v301_v17  ;;  %507 = vmatmul.bf16.gmra.mxu2 %v422_v18 }
 0x128   :  { %390 = vmatmul.bf16.gmra.mxu1 %v302_v23  ;;  %512 = vmatmul.bf16.gmra.mxu2 %v423_v24  ;;  %v1565_v23 = vld [vmem:[#allocation7 + $0xb8] sm:$0xff] }
 0x129   :  { %744 = vmatpush.bf16.msrb.mxu3 %v1565_v23 }
 0x155   :  { %v376_v25 = vpop.f32.mrf.mxu1 }
 0x156   :  { %v396_v38 = vadd.f32 %v1611_v36, %v376_v25 }
 0x15b   :  { %v498_v26 = vpop.f32.mrf.mxu2 }
 0x15c   :  { %v1945_v42 = vadd.f32 %v498_v26, %v396_v38  ;;  %v1561_v38 = vld [vmem:[#allocation7 + $0x98] sm:$0xff] }
 0x15d   :  { %v378_v27 = vpop.f32.mrf.mxu1 }
 0x15e   :  { %v397_v37 = vadd.f32 %v1611_v36, %v378_v27  ;;  %v540_v49 = vmul.f32 %v1945_v42, %v1945_v42 }
 0x163   :  { %v500_v28 = vpop.f32.mrf.mxu2 }
 0x164   :  { %v1943_v39 = vadd.f32 %v500_v28, %v397_v37  ;;  %v1564_v28 = vld [vmem:[#allocation7 + $0xb0] sm:$0xff] }
 0x165   :  { %745 = vmatpush.bf16.msrb.mxu3 %v1564_v28 }
 0x166   :  { %v541_v46 = vmul.f32 %v1943_v39, %v1943_v39  ;;  %v526_v50 = vadd.f32 %v1943_v39, %v1945_v42 }
 0x168   :  { %v548_v54 = vadd.f32 %v541_v46, %v540_v49  ;;  %v1558_v49 = vld [vmem:[#allocation7 + $0x80] sm:$0xff] }
 0x175   :  { %v381_v29 = vpop.f32.mrf.mxu1 }
 0x176   :  { %v398_v41 = vadd.f32 %v1611_v36, %v381_v29 }
 0x17b   :  { %v503_v30 = vpop.f32.mrf.mxu2 }
 0x17c   :  { %v1947_v44 = vadd.f32 %v503_v30, %v398_v41 }
 0x17d   :  { %v383_v31 = vpop.f32.mrf.mxu1 }
 0x17e   :  { %v399_v45 = vadd.f32 %v1611_v36, %v383_v31  ;;  %v542_v51 = vmul.f32 %v1947_v44, %v1947_v44  ;;  %v527_v56 = vadd.f32 %v526_v50, %v1947_v44 }
 0x180   :  { %v549_v60 = vadd.f32 %v548_v54, %v542_v51 }
 0x183   :  { %v505_v32 = vpop.f32.mrf.mxu2 }
 0x184   :  { %v1951_v47 = vadd.f32 %v505_v32, %v399_v45  ;;  %v1559_v45 = vld [vmem:[#allocation7 + $0x88] sm:$0xff] }
 0x186   :  { %v543_v57 = vmul.f32 %v1951_v47, %v1951_v47  ;;  %v528_v61 = vadd.f32 %v527_v56, %v1951_v47 }
 0x188   :  { %v550_v1 = vadd.f32 %v549_v60, %v543_v57 }
 0x195   :  { %v386_v33 = vpop.f32.mrf.mxu1 }
 0x196   :  { %v400_v48 = vadd.f32 %v1611_v36, %v386_v33  ;;  %v1563_v33 = vld [vmem:[#allocation7 + $0xa8] sm:$0xff] }
 0x197   :  { %746 = vmatpush.bf16.msrb.mxu3 %v1563_v33 }
 0x19b   :  { %v508_v34 = vpop.f32.mrf.mxu2 }
 0x19c   :  { %v1959_v52 = vadd.f32 %v508_v34, %v400_v48 }
 0x19d   :  { %v388_v35 = vpop.f32.mrf.mxu1 }
 0x19e   :  { %v401_v53 = vadd.f32 %v1611_v36, %v388_v35  ;;  %v544_v62 = vmul.f32 %v1959_v52, %v1959_v52  ;;  %v529_v2 = vadd.f32 %v528_v61, %v1959_v52 }
 0x1a0   :  { %v551_v4 = vadd.f32 %v550_v1, %v544_v62 }
 0x1a3   :  { %v510_v40 = vpop.f32.mrf.mxu2 }
 0x1a4   :  { %v1964_v58 = vadd.f32 %v510_v40, %v401_v53  ;;  %v1560_v40 = vld [vmem:[#allocation7 + $0x90] sm:$0xff] }
 0x1a5   :  { %v391_v43 = vpop.f32.mrf.mxu1 }
 0x1a6   :  { %v402_v59 = vadd.f32 %v1611_v36, %v391_v43  ;;  %v545_v3 = vmul.f32 %v1964_v58, %v1964_v58  ;;  %v530_v5 = vadd.f32 %v529_v2, %v1964_v58 }
 0x1a8   :  { %v552_v9 = vadd.f32 %v551_v4, %v545_v3 }
 0x1ab   :  { %v513_v55 = vpop.f32.mrf.mxu2 }
 0x1ac   :  { %v1969_v63 = vadd.f32 %v513_v55, %v402_v59  ;;  %v1612_v59 = vld [vmem:[#allocation8 + $0x2] ss:$0 sm:$0xff] }
 0x1ad   :  { %v393_v0 = vpop.f32.mrf.mxu1 }
 0x1ae   :  { %v546_v6 = vmul.f32 %v1969_v63, %v1969_v63  ;;  %v403_v7 = vadd.f32 %v1611_v36, %v393_v0  ;;  %v531_v10 = vadd.f32 %v530_v5, %v1969_v63  ;;  %v1562_v36 = vld [vmem:[#allocation7 + $0xa0] sm:$0xff] }
 0x1af   :  { %747 = vmatpush.bf16.msrb.mxu3 %v1562_v36 }
 0x1b0   :  { %v553_v12 = vadd.f32 %v552_v9, %v546_v6  ;;  %v1573_v9 = vld [vmem:[#allocation7 + $0xf8] sm:$0xff] }
 0x1b3   :  { %v515_v8 = vpop.f32.mrf.mxu2  ;;  %748 = vmatpush.bf16.msrb.mxu3 %v1561_v38 }
 0x1b4   :  { %v1978_v11 = vadd.f32 %v515_v8, %v403_v7 }
 0x1b6   :  { %v532_v13 = vadd.f32 %v531_v10, %v1978_v11  ;;  %v547_v14 = vmul.f32 %v1978_v11, %v1978_v11 }
 0x1b7   :  { %749 = vmatpush.bf16.msrb.mxu3 %v1560_v40 }
 0x1b8   :  { %v533_v15 = vrot.slane %v532_v13, 4  ;;  %v554_v16 = vadd.f32 %v553_v12, %v547_v14 }
 0x1ba   :  { %v534_v17 = vadd.f32 %v533_v15, %v532_v13  ;;  %v555_v18 = vrot.slane %v554_v16, 4 }
 0x1bb   :  { %750 = vmatpush.bf16.msrb.mxu3 %v1559_v45 }
 0x1bc   :  { %v535_v19 = vrot.slane %v534_v17, 2  ;;  %v556_v20 = vadd.f32 %v555_v18, %v554_v16  ;;  %v1572_v16 = vld [vmem:[#allocation7 + $0xf0] sm:$0xff] }
 0x1be   :  { %v536_v21 = vadd.f32 %v535_v19, %v534_v17  ;;  %v557_v22 = vrot.slane %v556_v20, 2 }
 0x1bf   :  { %751 = vmatpush.bf16.msrb.mxu3 %v1558_v49 }
 0x1c0   :  { %v537_v24 = vrot.slane %v536_v21, 1  ;;  %v558_v25 = vadd.f32 %v557_v22, %v556_v20 }
 0x1c2   :  { %v538_v26 = vadd.f32 %v537_v24, %v536_v21  ;;  %v559_v27 = vrot.slane %v558_v25, 1 }
 0x1c3   :  { %842 = vmatpush.bf16.msra.mxu3 %v1573_v9 }
 0x1c4   :  { %v539_v29 = vmul.f32 0.015625, %v538_v26  ;;  %v560_v30 = vadd.f32 %v559_v27, %v558_v25  ;;  %v1571_v26 = vld [vmem:[#allocation7 + $0xe8] sm:$0xff] }
 0x1c6   :  { %v561_v31 = vmul.f32 0.015625, %v560_v30  ;;  %v562_v32 = vmul.f32 %v539_v29, %v539_v29  ;;  %v565_v51 = vsub.f32 %v1945_v42, %v539_v29  ;;  %v566_v54 = vsub.f32 %v1943_v39, %v539_v29  ;;  %v1613_v39 = vld [vmem:[#allocation8 + $0x3] ss:$0 sm:$0xff] }
 0x1c7   :  { %v567_v55 = vsub.f32 %v1947_v44, %v539_v29  ;;  %v568_v56 = vsub.f32 %v1951_v47, %v539_v29  ;;  %v569_v57 = vsub.f32 %v1959_v52, %v539_v29  ;;  %v570_v60 = vsub.f32 %v1964_v58, %v539_v29  ;;  %843 = vmatpush.bf16.msra.mxu3 %v1572_v16 }
 0x1c8   :  { %v563_v34 = vsub.f32 %v561_v31, %v562_v32  ;;  %v571_v61 = vsub.f32 %v1969_v63, %v539_v29  ;;  %v572_v62 = vsub.f32 %v1978_v11, %v539_v29 }
 0x1ca   :  { %v564_v35 = vmax.f32 %v563_v34, 0.0 }
 0x1cb   :  { %844 = vmatpush.bf16.msra.mxu3 %v1571_v26 }
 0x1cc   :  { %v573_v37 = vadd.f32 1e-05, %v564_v35  ;;  %v1570_v35 = vld [vmem:[#allocation7 + $0xe0] sm:$0xff] }
 0x1ce   :  { %1620 = vrsqrt.f32 %v573_v37  ;;  %vm580_vm1 = vweird.f32 %v573_v37 }
 0x1cf   :  { %845 = vmatpush.bf16.msra.mxu3 %v1570_v35 }
 0x1d4   :  { %v1621_v41 = vpop.eup %1620 }
 0x1d5   :  { %v575_v43 = vmul.f32 %v1621_v41, %v573_v37  ;;  %vm581_vm0 = vweird.f32 %v1621_v41 }
 0x1d6   :  { %vm582_vm2 = vmor %vm580_vm1, %vm581_vm0 }
 0x1d7   :  { %v576_v46 = vmul.f32 %v1621_v41, %v575_v43 }
 0x1d9   :  { %v577_v48 = vmul.f32 0.5, %v576_v46 }
 0x1db   :  { %v578_v50 = vsub.f32 1.5, %v577_v48  ;;  %v1569_v48 = vld [vmem:[#allocation7 + $0xd8] sm:$0xff] }
 0x1dc   :  { %846 = vmatpush.bf16.msra.mxu3 %v1569_v48 }
 0x1dd   :  { %v579_v53 = vmul.f32 %v1621_v41, %v578_v50 }
 0x1df   :  { %v583_v42 = vsel %vm582_vm2, %v1621_v41, %v579_v53 }
 0x1e0   :  { %v584_v0 = vmul.f32 %v583_v42, %v565_v51  ;;  %v585_v1 = vmul.f32 %v583_v42, %v566_v54  ;;  %v586_v2 = vmul.f32 %v583_v42, %v567_v55  ;;  %v587_v3 = vmul.f32 %v583_v42, %v568_v56  ;;  %v1568_v56 = vld [vmem:[#allocation7 + $0xd0] sm:$0xff] }
 0x1e1   :  { %v588_v4 = vmul.f32 %v583_v42, %v569_v57  ;;  %v589_v44 = vmul.f32 %v583_v42, %v570_v60  ;;  %v590_v5 = vmul.f32 %v583_v42, %v571_v61  ;;  %v591_v47 = vmul.f32 %v583_v42, %v572_v62  ;;  %847 = vmatpush.bf16.msra.mxu3 %v1568_v56  ;;  %v1589_v56 = vld [vmem:[#allocation7 + $0x178] sm:$0xff] }
 0x1e2   :  { %v594_v6 = vmul.f32 %v1612_v59, %v584_v0  ;;  %v595_v52 = vmul.f32 %v1612_v59, %v585_v1  ;;  %v596_v7 = vmul.f32 %v1612_v59, %v586_v2  ;;  %v597_v8 = vmul.f32 %v1612_v59, %v587_v3  ;;  %1108 = vmatpush.bf16.msrb.mxu2 %v1589_v56 }
 0x1e3   :  { %v598_v58 = vmul.f32 %v1612_v59, %v588_v4  ;;  %v599_v10 = vmul.f32 %v1612_v59, %v589_v44  ;;  %v600_v63 = vmul.f32 %v1612_v59, %v590_v5  ;;  %v601_v12 = vmul.f32 %v1612_v59, %v591_v47  ;;  %v1567_v4 = vld [vmem:[#allocation7 + $0xc8] sm:$0xff]  ;;  %v1566_v47 = vld [vmem:[#allocation7 + $0xc0] sm:$0xff] }
 0x1e4   :  { %v604_v11 = vadd.f32 %v1613_v39, %v594_v6  ;;  %v605_v13 = vadd.f32 %v1613_v39, %v595_v52  ;;  %v1991_v14 = vadd.f32 %v1613_v39, %v596_v7  ;;  %v1993_v15 = vadd.f32 %v1613_v39, %v597_v8 }
 0x1e5   :  { %v611_v17 = vadd.f32 %v1613_v39, %v601_v12  ;;  %v1995_v18 = vadd.f32 %v1613_v39, %v598_v58  ;;  %v1997_v19 = vadd.f32 %v1613_v39, %v599_v10  ;;  %v1999_v23 = vadd.f32 %v1613_v39, %v600_v63  ;;  %848 = vmatpush.bf16.msra.mxu3 %v1567_v4  ;;  %v1579_v4 = vld [vmem:[#allocation7 + $0x128] sm:$0xff] }
 0x1e6   :  { %v620_v21 = vmin.f32 %v604_v11, 0.0  ;;  %v621_v22 = vmin.f32 %v605_v13, 0.0  ;;  %v622_v24 = vmin.f32 %v1991_v14, 0.0  ;;  %v623_v25 = vmin.f32 %v1993_v15, 0.0 }
 0x1e7   :  { %v627_v20 = vmin.f32 %v611_v17, 0.0  ;;  %v624_v31 = vmin.f32 %v1995_v18, 0.0  ;;  %v625_v33 = vmin.f32 %v1997_v19, 0.0  ;;  %v626_v34 = vmin.f32 %v1999_v23, 0.0 }
 0x1e8   :  { %v628_v28 = vmul.f32 1.442695, %v620_v21  ;;  %v630_v29 = vmul.f32 1.442695, %v621_v22  ;;  %v632_v30 = vmul.f32 1.442695, %v622_v24 }
 0x1e9   :  { %v642_v27 = vmul.f32 1.442695, %v627_v20  ;;  %v634_v32 = vmul.f32 1.442695, %v623_v25  ;;  %v636_v36 = vmul.f32 1.442695, %v624_v31  ;;  %849 = vmatpush.bf16.msra.mxu3 %v1566_v47 }
 0x1ea   :  { %v638_v37 = vmul.f32 1.442695, %v625_v33  ;;  %v640_v38 = vmul.f32 1.442695, %v626_v34  ;;  %vm619_vm3 = vcmp.gt.f32.partialorder %v611_v17, 0.0  ;;  %vm612_vm4 = vcmp.gt.f32.partialorder %v604_v11, 0.0 }
 0x1eb   :  { %1622 = vpow2.f32 %v642_v27  ;;  %vm613_vm5 = vcmp.gt.f32.partialorder %v605_v13, 0.0  ;;  %vm614_vm6 = vcmp.gt.f32.partialorder %v1991_v14, 0.0  ;;  %vm615_vm7 = vcmp.gt.f32.partialorder %v1993_v15, 0.0  ;;  %v1614_v21 = vld [vmem:[#allocation8 + $0x4] ss:$0 sm:$0xff] }
 0x1ec   :  { %1624 = vpow2.f32 %v628_v28  ;;  %vm616_vm8 = vcmp.gt.f32.partialorder %v1995_v18, 0.0  ;;  %vm617_vm9 = vcmp.gt.f32.partialorder %v1997_v19, 0.0  ;;  %vm618_vm10 = vcmp.gt.f32.partialorder %v1999_v23, 0.0  ;;  %v1586_v47 = vld [vmem:[#allocation7 + $0x160] sm:$0xff] }
 0x1ed   :  { %1626 = vpow2.f32 %v630_v29 }
 0x1ee   :  { %1628 = vpow2.f32 %v632_v30 }
 0x1ef   :  { %1630 = vpow2.f32 %v634_v32 }
 0x1f0   :  { %1632 = vpow2.f32 %v636_v36 }
 0x1f1   :  { %v1623_v40 = vpop.eup %1622  ;;  %1634 = vpow2.f32 %v638_v37 }
 0x1f2   :  { %v1625_v41 = vpop.eup %1624  ;;  %v1391_v43 = vadd.f32 -1.0, %v1623_v40  ;;  %1636 = vpow2.f32 %v640_v38 }
 0x1f3   :  { %v1627_v45 = vpop.eup %1626  ;;  %v1384_v46 = vadd.f32 -1.0, %v1625_v41 }
 0x1f4   :  { %v1629_v49 = vpop.eup %1628  ;;  %v659_v50 = vsel %vm619_vm3, %v611_v17, %v1391_v43  ;;  %v1385_v51 = vadd.f32 -1.0, %v1627_v45 }
 0x1f5   :  { %v1631_v53 = vpop.eup %1630  ;;  %667 = vst [vmem:[#allocation11 + $0x38] sm:$0xff] %v659_v50  ;;  %v1386_v54 = vadd.f32 -1.0, %v1629_v49  ;;  %v652_v55 = vsel %vm612_vm4, %v604_v11, %v1384_v46 }
 0x1f6   :  { %v1633_v57 = vpop.eup %1632  ;;  %v1387_v59 = vadd.f32 -1.0, %v1631_v53  ;;  %v653_v60 = vsel %vm613_vm5, %v605_v13, %v1385_v51  ;;  %660 = vst [vmem:[#allocation11] sm:$0xff] %v652_v55 }
 0x1f7   :  { %v1635_v61 = vpop.eup %1634  ;;  %v654_v62 = vsel %vm614_vm6, %v1991_v14, %v1386_v54  ;;  %661 = vst [vmem:[#allocation11 + $0x8] sm:$0xff] %v653_v60  ;;  %v1388_v42 = vadd.f32 -1.0, %v1633_v57  ;;  %v1581_v57 = vld [vmem:[#allocation7 + $0x138] sm:$0xff] }
 0x1f8   :  { %v1637_v0 = vpop.eup %1636  ;;  %v655_v1 = vsel %vm615_vm7, %v1993_v15, %v1387_v59  ;;  %662 = vst [vmem:[#allocation11 + $0x10] sm:$0xff] %v654_v62  ;;  %v1389_v2 = vadd.f32 -1.0, %v1635_v61  ;;  %1022 = vmatpush.bf16.msrb.mxu1 %v1581_v57 }
 0x1f9   :  { %663 = vst [vmem:[#allocation11 + $0x18] sm:$0xff] %v655_v1  ;;  %v1390_v3 = vadd.f32 -1.0, %v1637_v0  ;;  %v656_v39 = vsel %vm616_vm8, %v1995_v18, %v1388_v42  ;;  %v1588_v42 = vld [vmem:[#allocation7 + $0x170] sm:$0xff] }
 0x1fa   :  { %v657_v44 = vsel %vm617_vm9, %v1997_v19, %v1389_v2  ;;  %664 = vst [vmem:[#allocation11 + $0x20] sm:$0xff] %v656_v39  ;;  %v1580_v0 = vld [vmem:[#allocation7 + $0x130] sm:$0xff]  ;;  %1109 = vmatpush.bf16.msrb.mxu2 %v1588_v42  ;;  %v1587_v39 = vld [vmem:[#allocation7 + $0x168] sm:$0xff] }
 0x1fb   :  { %v658_v5 = vsel %vm618_vm10, %v1999_v23, %v1390_v3  ;;  %665 = vst [vmem:[#allocation11 + $0x28] sm:$0xff] %v657_v44 }
 0x1fc   :  { %666 = vst [vmem:[#allocation11 + $0x30] sm:$0xff] %v658_v5  ;;  %1023 = vmatpush.bf16.msrb.mxu1 %v1580_v0 }
 0x1fd   :  { %1207 = dma.vmem_to_hbm [thread:$0]  %s1200_s25, 1024, %s1202_s23, [#allocation12], %s1864_s21, %s1864_s21, %s1865_s22  }
 0x1fe   :  { %v670_v6 = vld [vmem:[#allocation11] ss:$2 sm:$0xff]  ;;  %v768_v10 = vld [vmem:[#allocation11 + $0x1] ss:$2 sm:$0xff]  ;;  %1110 = vmatpush.bf16.msrb.mxu2 %v1587_v39 }
 0x200   :  { %v672_v52 = vld [vmem:[#allocation11 + $0x10] ss:$2 sm:$0xff]  ;;  %v770_v63 = vld [vmem:[#allocation11 + $0x11] ss:$2 sm:$0xff]  ;;  %1024 = vmatpush.bf16.msrb.mxu1 %v1579_v4 }
 0x201   :  { %v677_v7 = vpack.c.bf16 %v672_v52, %v670_v6  ;;  %v775_v12 = vpack.c.bf16 %v770_v63, %v768_v10  ;;  %v1578_v6 = vld [vmem:[#allocation7 + $0x120] sm:$0xff]  ;;  %v1585_v52 = vld [vmem:[#allocation7 + $0x158] sm:$0xff]  ;;  %v1576_v10 = vld [vmem:[#allocation7 + $0x110] sm:$0xff] }
 0x202   :  { %v674_v8 = vld [vmem:[#allocation11 + $0x20] ss:$2 sm:$0xff]  ;;  %v772_v11 = vld [vmem:[#allocation11 + $0x21] ss:$2 sm:$0xff]  ;;  %1111 = vmatpush.bf16.msrb.mxu2 %v1586_v47 }
 0x203   :  { %752 = vmatmul.bf16.vlgmr.msrb.gmra.mxu3 %v677_v7  ;;  %v676_v9 = vld [vmem:[#allocation11 + $0x30] ss:$2 sm:$0xff]  ;;  %v774_v13 = vld [vmem:[#allocation11 + $0x31] ss:$2 sm:$0xff]  ;;  %v1577_v7 = vld [vmem:[#allocation7 + $0x118] sm:$0xff] }
 0x204   :  { %v678_v58 = vpack.c.bf16 %v676_v9, %v674_v8  ;;  %v776_v14 = vpack.c.bf16 %v774_v13, %v772_v11  ;;  %1025 = vmatpush.bf16.msrb.mxu1 %v1578_v6  ;;  %v1575_v11 = vld [vmem:[#allocation7 + $0x108] sm:$0xff] }
 0x206   :  { %1112 = vmatpush.bf16.msrb.mxu2 %v1585_v52 }
 0x208   :  { %1026 = vmatpush.bf16.msrb.mxu1 %v1577_v7 }
 0x20c   :  { %1027 = vmatpush.bf16.msrb.mxu1 %v1576_v10 }
 0x210   :  { %1028 = vmatpush.bf16.msrb.mxu1 %v1575_v11 }
 0x213   :  { %757 = vmatmul.bf16.gmra.mxu3 %v678_v58  ;;  %v1584_v58 = vld [vmem:[#allocation7 + $0x150] sm:$0xff] }
 0x214   :  { %1113 = vmatpush.bf16.msrb.mxu2 %v1584_v58 }
 0x223   :  { %850 = vmatmul.bf16.vlgmr.msra.gmra.mxu3 %v775_v12  ;;  %v1583_v12 = vld [vmem:[#allocation7 + $0x148] sm:$0xff] }
 0x224   :  { %1114 = vmatpush.bf16.msrb.mxu2 %v1583_v12 }
 0x233   :  { %855 = vmatmul.bf16.gmra.mxu3 %v776_v14 }
 0x286   :  { %v753_v15 = vpop.f32.mrf.mxu3 }
 0x287   :  { %v763_v24 = vadd.f32 %v1614_v21, %v753_v15  ;;  %v1582_v15 = vld [vmem:[#allocation7 + $0x140] sm:$0xff] }
 0x288   :  { %1115 = vmatpush.bf16.msrb.mxu2 %v1582_v15 }
 0x28e   :  { %v755_v16 = vpop.f32.mrf.mxu3 }
 0x28f   :  { %v764_v22 = vadd.f32 %v1614_v21, %v755_v16  ;;  %v1574_v16 = vld [vmem:[#allocation7 + $0x100] sm:$0xff] }
 0x290   :  { %1029 = vmatpush.bf16.msrb.mxu1 %v1574_v16 }
 0x296   :  { %v758_v17 = vpop.f32.mrf.mxu3 }
 0x297   :  { %v765_v25 = vadd.f32 %v1614_v21, %v758_v17 }
 0x29e   :  { %v760_v18 = vpop.f32.mrf.mxu3 }
 0x29f   :  { %v766_v30 = vadd.f32 %v1614_v21, %v760_v18 }
 0x2a6   :  { %v851_v19 = vpop.f32.mrf.mxu3 }
 0x2a7   :  { %v2018_v27 = vadd.f32 %v851_v19, %v763_v24 }
 0x2a9   :  { %v875_v31 = vmul.f32 %v2018_v27, %v2018_v27 }
 0x2ae   :  { %v853_v20 = vpop.f32.mrf.mxu3 }
 0x2af   :  { %v2016_v26 = vadd.f32 %v853_v20, %v764_v22  ;;  %v1615_v22 = vld [vmem:[#allocation8 + $0x5] ss:$0 sm:$0xff] }
 0x2b1   :  { %v876_v29 = vmul.f32 %v2016_v26, %v2016_v26  ;;  %v865_v32 = vadd.f32 %v2016_v26, %v2018_v27 }
 0x2b3   :  { %v879_v35 = vadd.f32 %v876_v29, %v875_v31  ;;  %v1616_v31 = vld [vmem:[#allocation8 + $0x6] ss:$0 sm:$0xff] }
 0x2b6   :  { %v856_v23 = vpop.f32.mrf.mxu3 }
 0x2b7   :  { %v2020_v28 = vadd.f32 %v856_v23, %v765_v25 }
 0x2b9   :  { %v877_v33 = vmul.f32 %v2020_v28, %v2020_v28  ;;  %v866_v36 = vadd.f32 %v865_v32, %v2020_v28 }
 0x2bb   :  { %v880_v38 = vadd.f32 %v879_v35, %v877_v33 }
 0x2be   :  { %v858_v34 = vpop.f32.mrf.mxu3 }
 0x2bf   :  { %v2031_v37 = vadd.f32 %v858_v34, %v766_v30 }
 0x2c1   :  { %v867_v40 = vadd.f32 %v866_v36, %v2031_v37  ;;  %v878_v41 = vmul.f32 %v2031_v37, %v2031_v37 }
 0x2c3   :  { %v868_v43 = vrot.slane %v867_v40, 4  ;;  %v881_v45 = vadd.f32 %v880_v38, %v878_v41 }
 0x2c5   :  { %v869_v46 = vadd.f32 %v868_v43, %v867_v40  ;;  %v882_v48 = vrot.slane %v881_v45, 4 }
 0x2c7   :  { %v870_v49 = vrot.slane %v869_v46, 2  ;;  %v883_v50 = vadd.f32 %v882_v48, %v881_v45 }
 0x2c9   :  { %v871_v51 = vadd.f32 %v870_v49, %v869_v46  ;;  %v884_v53 = vrot.slane %v883_v50, 2 }
 0x2cb   :  { %v872_v54 = vrot.slane %v871_v51, 1  ;;  %v885_v55 = vadd.f32 %v884_v53, %v883_v50 }
 0x2cd   :  { %v873_v59 = vadd.f32 %v872_v54, %v871_v51  ;;  %v886_v60 = vrot.slane %v885_v55, 1 }
 0x2cf   :  { %v874_v61 = vmul.f32 0.03125, %v873_v59  ;;  %v887_v62 = vadd.f32 %v886_v60, %v885_v55 }
 0x2d1   :  { %v888_v1 = vmul.f32 0.03125, %v887_v62  ;;  %v889_v2 = vmul.f32 %v874_v61, %v874_v61  ;;  %v892_v18 = vsub.f32 %v2018_v27, %v874_v61  ;;  %v893_v19 = vsub.f32 %v2016_v26, %v874_v61 }
 0x2d2   :  { %v894_v20 = vsub.f32 %v2020_v28, %v874_v61  ;;  %v895_v21 = vsub.f32 %v2031_v37, %v874_v61 }
 0x2d3   :  { %v890_v3 = vsub.f32 %v888_v1, %v889_v2 }
 0x2d5   :  { %v891_v44 = vmax.f32 %v890_v3, 0.0 }
 0x2d7   :  { %v896_v5 = vadd.f32 1e-05, %v891_v44 }
 0x2d9   :  { %1638 = vrsqrt.f32 %v896_v5  ;;  %vm903_vm12 = vweird.f32 %v896_v5 }
 0x2df   :  { %v1639_v8 = vpop.eup %1638 }
 0x2e0   :  { %v898_v9 = vmul.f32 %v1639_v8, %v896_v5  ;;  %vm904_vm11 = vweird.f32 %v1639_v8  ;;  %v1617_v5 = vld [vmem:[#allocation8 + $0x7] ss:$0 sm:$0xff] }
 0x2e1   :  { %vm905_vm13 = vmor %vm903_vm12, %vm904_vm11 }
 0x2e2   :  { %v899_v63 = vmul.f32 %v1639_v8, %v898_v9 }
 0x2e4   :  { %v900_v13 = vmul.f32 0.5, %v899_v63 }
 0x2e6   :  { %v901_v14 = vsub.f32 1.5, %v900_v13 }
 0x2e8   :  { %v902_v17 = vmul.f32 %v1639_v8, %v901_v14 }
 0x2ea   :  { %v906_v23 = vsel %vm905_vm13, %v1639_v8, %v902_v17 }
 0x2eb   :  { %v907_v24 = vmul.f32 %v906_v23, %v892_v18  ;;  %v908_v25 = vmul.f32 %v906_v23, %v893_v19  ;;  %v909_v29 = vmul.f32 %v906_v23, %v894_v20  ;;  %v910_v30 = vmul.f32 %v906_v23, %v895_v21 }
 0x2ed   :  { %v913_v32 = vmul.f32 %v1615_v22, %v907_v24  ;;  %v914_v33 = vmul.f32 %v1615_v22, %v908_v25  ;;  %v915_v34 = vmul.f32 %v1615_v22, %v909_v29  ;;  %v916_v27 = vmul.f32 %v1615_v22, %v910_v30 }
 0x2ef   :  { %v919_v35 = vadd.f32 %v1616_v31, %v913_v32  ;;  %v920_v26 = vadd.f32 %v1616_v31, %v914_v33  ;;  %v921_v36 = vadd.f32 %v1616_v31, %v915_v34  ;;  %v922_v28 = vadd.f32 %v1616_v31, %v916_v27 }
 0x2f1   :  { %v927_v38 = vmin.f32 %v919_v35, 0.0  ;;  %v928_v37 = vmin.f32 %v920_v26, 0.0  ;;  %v929_v40 = vmin.f32 %v921_v36, 0.0  ;;  %v930_v41 = vmin.f32 %v922_v28, 0.0 }
 0x2f2   :  { %vm923_vm14 = vcmp.gt.f32.partialorder %v919_v35, 0.0  ;;  %vm924_vm15 = vcmp.gt.f32.partialorder %v920_v26, 0.0  ;;  %vm925_vm0 = vcmp.gt.f32.partialorder %v921_v36, 0.0  ;;  %vm926_vm1 = vcmp.gt.f32.partialorder %v922_v28, 0.0 }
 0x2f3   :  { %v931_v43 = vmul.f32 1.442695, %v927_v38  ;;  %v933_v45 = vmul.f32 1.442695, %v928_v37  ;;  %v935_v46 = vmul.f32 1.442695, %v929_v40 }
 0x2f4   :  { %v937_v48 = vmul.f32 1.442695, %v930_v41  ;;  %v1618_v37 = vld [vmem:[#allocation8 + $0x8] ss:$0 sm:$0xff] }
 0x2f5   :  { %1640 = vpow2.f32 %v931_v43 }
 0x2f6   :  { %1642 = vpow2.f32 %v933_v45  ;;  %v1619_v45 = vld [vmem:[#allocation8 + $0x9] ss:$0 sm:$0xff] }
 0x2f7   :  { %1644 = vpow2.f32 %v935_v46 }
 0x2f8   :  { %1646 = vpow2.f32 %v937_v48 }
 0x2fb   :  { %v1641_v49 = vpop.eup %1640 }
 0x2fc   :  { %v1643_v50 = vpop.eup %1642  ;;  %v1456_v51 = vadd.f32 -1.0, %v1641_v49 }
 0x2fd   :  { %v1645_v53 = vpop.eup %1644  ;;  %v1457_v54 = vadd.f32 -1.0, %v1643_v50 }
 0x2fe   :  { %v1647_v55 = vpop.eup %1646  ;;  %v1458_v56 = vadd.f32 -1.0, %v1645_v53  ;;  %v943_v57 = vsel %vm923_vm14, %v919_v35, %v1456_v51 }
 0x2ff   :  { %v1459_v59 = vadd.f32 -1.0, %v1647_v55  ;;  %v944_v60 = vsel %vm924_vm15, %v920_v26, %v1457_v54  ;;  %947 = vst [vmem:[#allocation13] sm:$0xff] %v943_v57 }
 0x300   :  { %v945_v61 = vsel %vm925_vm0, %v921_v36, %v1458_v56  ;;  %948 = vst [vmem:[#allocation13 + $0x8] sm:$0xff] %v944_v60 }
 0x301   :  { %v946_v62 = vsel %vm926_vm1, %v922_v28, %v1459_v59  ;;  %949 = vst [vmem:[#allocation13 + $0x10] sm:$0xff] %v945_v61 }
 0x302   :  { %950 = vst [vmem:[#allocation13 + $0x18] sm:$0xff] %v946_v62 }
 0x303   :  { %1220 = dma.vmem_to_hbm [thread:$0]  %s1213_s11, 512, %s1215_s9, [#allocation12], %s1864_s21, %s1864_s21, %s1865_s22  }
 0x307   :  { %v953_v42 = vld [vmem:[#allocation13] ss:$2 sm:$0xff]  ;;  %v1039_v0 = vld [vmem:[#allocation13 + $0x1] ss:$2 sm:$0xff] }
 0x309   :  { %v955_v1 = vld [vmem:[#allocation13 + $0x10] ss:$2 sm:$0xff]  ;;  %v1041_v2 = vld [vmem:[#allocation13 + $0x11] ss:$2 sm:$0xff] }
 0x30a   :  { %v956_v3 = vpack.c.bf16 %v955_v1, %v953_v42  ;;  %v1042_v39 = vpack.c.bf16 %v1041_v2, %v1039_v0 }
 0x30c   :  { %1030 = vmatmul.bf16.vlgmr.msrb.gmra.mxu1 %v956_v3  ;;  %1116 = vmatmul.bf16.vlgmr.msrb.gmra.mxu2 %v1042_v39 }
 0x389   :  { %v1031_v4 = vpop.f32.mrf.mxu1 }
 0x38a   :  { %v1036_v6 = vadd.f32 %v1617_v5, %v1031_v4 }
 0x38f   :  { %v1117_v44 = vpop.f32.mrf.mxu2 }
 0x390   :  { %v1122_v52 = vadd.f32 %v1117_v44, %v1036_v6 }
 0x391   :  { %v1033_v47 = vpop.f32.mrf.mxu1 }
 0x392   :  { %v1037_v7 = vadd.f32 %v1617_v5, %v1033_v47  ;;  %v1132_v58 = vmul.f32 %v1122_v52, %v1122_v52 }
 0x397   :  { %v1119_v8 = vpop.f32.mrf.mxu2 }
 0x398   :  { %v1123_v9 = vadd.f32 %v1119_v8, %v1037_v7 }
 0x39a   :  { %v1124_v10 = vadd.f32 %v1123_v9, %v1122_v52  ;;  %v1133_v63 = vmul.f32 %v1123_v9, %v1123_v9 }
 0x39c   :  { %v1125_v12 = vrot.slane %v1124_v10, 4  ;;  %v1134_v11 = vadd.f32 %v1133_v63, %v1132_v58 }
 0x39e   :  { %v1126_v13 = vadd.f32 %v1125_v12, %v1124_v10  ;;  %v1135_v14 = vrot.slane %v1134_v11, 4 }
 0x3a0   :  { %v1127_v15 = vrot.slane %v1126_v13, 2  ;;  %v1136_v16 = vadd.f32 %v1135_v14, %v1134_v11 }
 0x3a2   :  { %v1128_v17 = vadd.f32 %v1127_v15, %v1126_v13  ;;  %v1137_v18 = vrot.slane %v1136_v16, 2 }
 0x3a4   :  { %v1129_v19 = vrot.slane %v1128_v17, 1  ;;  %v1138_v20 = vadd.f32 %v1137_v18, %v1136_v16 }
 0x3a6   :  { %v1130_v21 = vadd.f32 %v1129_v19, %v1128_v17  ;;  %v1139_v22 = vrot.slane %v1138_v20, 1 }
 0x3a8   :  { %v1131_v23 = vmul.f32 0.0625, %v1130_v21  ;;  %v1140_v24 = vadd.f32 %v1139_v22, %v1138_v20 }
 0x3aa   :  { %v1141_v25 = vmul.f32 0.0625, %v1140_v24  ;;  %v1142_v29 = vmul.f32 %v1131_v23, %v1131_v23  ;;  %v1145_v28 = vsub.f32 %v1122_v52, %v1131_v23  ;;  %v1146_v38 = vsub.f32 %v1123_v9, %v1131_v23 }
 0x3ac   :  { %v1143_v30 = vsub.f32 %v1141_v25, %v1142_v29 }
 0x3ae   :  { %v1144_v31 = vmax.f32 %v1143_v30, 0.0 }
 0x3b0   :  { %v1147_v32 = vadd.f32 1e-05, %v1144_v31 }
 0x3b2   :  { %1648 = vrsqrt.f32 %v1147_v32  ;;  %vm1154_vm3 = vweird.f32 %v1147_v32 }
 0x3b8   :  { %v1649_v33 = vpop.eup %1648 }
 0x3b9   :  { %v1149_v34 = vmul.f32 %v1649_v33, %v1147_v32  ;;  %vm1155_vm2 = vweird.f32 %v1649_v33 }
 0x3ba   :  { %vm1156_vm4 = vmor %vm1154_vm3, %vm1155_vm2 }
 0x3bb   :  { %v1150_v27 = vmul.f32 %v1649_v33, %v1149_v34 }
 0x3bd   :  { %v1151_v35 = vmul.f32 0.5, %v1150_v27 }
 0x3bf   :  { %v1152_v26 = vsub.f32 1.5, %v1151_v35 }
 0x3c1   :  { %v1153_v36 = vmul.f32 %v1649_v33, %v1152_v26 }
 0x3c3   :  { %v1157_v40 = vsel %vm1156_vm4, %v1649_v33, %v1153_v36 }
 0x3c4   :  { %v1158_v41 = vmul.f32 %v1157_v40, %v1145_v28  ;;  %v1159_v43 = vmul.f32 %v1157_v40, %v1146_v38 }
 0x3c6   :  { %v1162_v46 = vmul.f32 %v1618_v37, %v1158_v41  ;;  %v1163_v48 = vmul.f32 %v1618_v37, %v1159_v43 }
 0x3c8   :  { %v1167_v49 = vadd.f32 %v1619_v45, %v1163_v48  ;;  %v1166_v50 = vadd.f32 %v1619_v45, %v1162_v46 }
 0x3ca   :  { %v1170_v51 = vmin.f32 %v1166_v50, 0.0  ;;  %v1171_v53 = vmin.f32 %v1167_v49, 0.0  ;;  %vm1168_vm5 = vcmp.gt.f32.partialorder %v1166_v50, 0.0  ;;  %vm1169_vm6 = vcmp.gt.f32.partialorder %v1167_v49, 0.0 }
 0x3cc   :  { %v1172_v54 = vmul.f32 1.442695, %v1170_v51  ;;  %v1174_v55 = vmul.f32 1.442695, %v1171_v53 }
 0x3ce   :  { %1650 = vpow2.f32 %v1172_v54 }
 0x3cf   :  { %1652 = vpow2.f32 %v1174_v55 }
 0x3d4   :  { %v1651_v56 = vpop.eup %1650 }
 0x3d5   :  { %v1653_v57 = vpop.eup %1652  ;;  %v1524_v59 = vadd.f32 -1.0, %v1651_v56 }
 0x3d6   :  { %v1525_v60 = vadd.f32 -1.0, %v1653_v57 }
 0x3d7   :  { %v1178_v61 = vsel %vm1168_vm5, %v1166_v50, %v1524_v59 }
 0x3d8   :  { %v1179_v62 = vsel %vm1169_vm6, %v1167_v49, %v1525_v60  ;;  %1180 = vst [vmem:[#allocation14] sm:$0xff] %v1178_v61 }
 0x3d9   :  { %1181 = vst [vmem:[#allocation14 + $0x8] sm:$0xff] %v1179_v62 }
 0x3da   :  { %1233 = dma.vmem_to_hbm [thread:$0]  %s1226_s6, 256, %s1228_s14, [#allocation15], %s1864_s21, %s1864_s21, %s1865_s22  }
 0x3db   :  { %1852 = dma.done.wait [#allocation4], 2048  }
 0x3dc   :  { %1853 = vsyncadd [#allocation4], 4294965248 }
 0x3dd   :  { %1854 = dma.done.wait [#allocation12], 1536  }
 0x3de   :  { %1855 = vsyncadd [#allocation12], 4294965760 }
 0x3df   :  { %1856 = dma.done.wait [#allocation15], 256  }
 0x3e0   :  { %1857 = vsyncadd [#allocation15], 4294967040 }
 0x3e1   :  { %1250 = vsyncpa [#allocation3], 1 }
 0x3e2   :  { %1251 = vsyncpa [#allocation6], 1 }
 0x3e3   :  { %1252 = vsyncpa [#allocation9], 1 }
 0x3e4   :  { %1253 = vsyncpa [#allocation4], 1 }
 0x3e5   :  { %1254 = vsyncpa [#allocation12], 1 }
 0x3e6   :  { %1255 = vsyncpa [#allocation15], 1 }

</bundles_post_ra>
